<compile_context>
chip_gen: v7x
topology: tpu7x:2x2x1
jax: 0.10.0
libtpu: 0.0.40
codegen_flags: <defaults>
</compile_context>

<pallas_src>
import numpy as np
import jax
import jax.numpy as jnp
from jax.experimental import pallas as pl
from jax.experimental.pallas import tpu as pltpu


def _interp_matrix_np(n_in, n_out):
    """1-D linear interpolation matrix [n_out, n_in], align_corners=True."""
    A = np.zeros((n_out, n_in), dtype=np.float32)
    if n_in == 1:
        A[:, 0] = 1.0
        return A
    for i in range(n_out):
        src = i * (n_in - 1) / (n_out - 1)
        lo = min(int(np.floor(src)), n_in - 2)
        frac = src - lo
        A[i, lo] += 1.0 - frac
        A[i, lo + 1] += frac
    return A


# -------- pass 1: conv(1x1) + ReLU, emit per-block BN partial sums only ------
def _conv_relu_stats_kernel(x_ref, w_ref, s_ref, sq_ref):
    # x_ref : (1, Cin, thw)     one image, one spatial tile (lane-dense)
    # w_ref : (Cout, Cin)       grid-invariant
    # s_ref / sq_ref : (1, 1, Cout, 1)  per-block partials (parallel grid)
    y = jnp.dot(w_ref[...], x_ref[0], preferred_element_type=jnp.float32)  # [Cout, thw]
    y = jnp.maximum(y, 0.0)                                                # ReLU
    s_ref[0, 0] = jnp.sum(y, axis=1, keepdims=True)
    sq_ref[0, 0] = jnp.sum(y * y, axis=1, keepdims=True)


# -------- pass 2: conv(1x1) + ReLU + BN affine + bilinear x2, NCHW output ----
def _conv_bn_upsample_kernel(x_ref, w_ref, scale_ref, shift_ref,
                             ah_ref, awt_ref, o_ref):
    # x_ref     : (1, Cin, H, W)   one image, all input channels
    # w_ref     : (1, Cin, 1, 1)   conv weights for this output channel
    # scale_ref : (1, 1, 1)        BN scale for this channel (gamma/sqrt(var+eps))
    # shift_ref : (1, 1, 1)        BN shift for this channel (beta - mean*scale)
    # ah_ref    : (H2, H)          H-interp matrix (align_corners=True)
    # awt_ref   : (W, W2)          W-interp matrix, transposed
    # o_ref     : (1, 1, H2, W2)   NCHW output block
    cin = x_ref.shape[1]

    # 1x1 conv for one output channel: unrolled VPU broadcast-FMA over Cin.
    acc = x_ref[0, 0] * w_ref[0, 0]
    for ci in range(1, cin):
        acc = acc + x_ref[0, ci] * w_ref[0, ci]

    # ReLU + BatchNorm affine (batch statistics folded into scale/shift).
    z = jnp.maximum(acc, 0.0) * scale_ref[0] + shift_ref[0]                 # [H, W]

    # Separable bilinear x2 upsample: Ah @ z @ Aw^T (two small MXU matmuls).
    u = jnp.dot(ah_ref[...], z, preferred_element_type=jnp.float32)         # [H2, W]
    o_ref[0, 0] = jnp.dot(u, awt_ref[...], preferred_element_type=jnp.float32)  # [H2, W2]


def transition_layer_forward(x_nchw, conv_w, gamma, beta, eps=1e-5):
    N, Cin, H, W = x_nchw.shape
    Cout = conv_w.shape[0]
    H2, W2 = 2 * H, 2 * W
    HW = H * W
    M = N * HW

    x = x_nchw.astype(jnp.float32)
    wm = conv_w.reshape(Cout, Cin).astype(jnp.float32)      # [Cout, Cin]
    w4 = wm.reshape(Cout, Cin, 1, 1)                         # per-channel blocks

    # ---- spatial tile for the stats pass (last block dim: multiple of 128
    #      or the full spatial extent; large tiles amortize grid overhead).
    thw = HW
    if HW > 2048:
        for cand in (2048, 1024, 512, 256, 128):
            if HW % cand == 0:
                thw = cand
                break
    nhw = HW // thw

    x3 = x.reshape(N, Cin, HW)                               # free reshape (NCHW)

    # ---------------- pass 1: BN batch statistics (parallel partials) --------
    s_part, sq_part = pl.pallas_call(
        _conv_relu_stats_kernel,
        out_shape=(
            jax.ShapeDtypeStruct((N, nhw, Cout, 1), jnp.float32),
            jax.ShapeDtypeStruct((N, nhw, Cout, 1), jnp.float32),
        ),
        grid_spec=pltpu.PrefetchScalarGridSpec(
            num_scalar_prefetch=0,
            grid=(N, nhw),
            in_specs=[
                pl.BlockSpec((1, Cin, thw), lambda n, j: (n, 0, j)),
                pl.BlockSpec((Cout, Cin), lambda n, j: (0, 0)),   # grid-invariant
            ],
            out_specs=[
                pl.BlockSpec((1, 1, Cout, 1), lambda n, j: (n, j, 0, 0)),
                pl.BlockSpec((1, 1, Cout, 1), lambda n, j: (n, j, 0, 0)),
            ],
        ),
        compiler_params=pltpu.CompilerParams(
            dimension_semantics=("parallel", "parallel")),
    )(x3, wm)

    # Tiny final reduction + BN affine folding (scale/shift per channel).
    s = jnp.sum(s_part, axis=(0, 1))[:, 0]                   # [Cout]
    sq = jnp.sum(sq_part, axis=(0, 1))[:, 0]                 # [Cout]
    mean = s / M
    # E[y^2]-E[y]^2 can cancel; clamp at 0 (post-ReLU activations keep it benign).
    var = jnp.maximum(sq / M - mean * mean, 0.0)
    scale = gamma.astype(jnp.float32) / jnp.sqrt(var + eps)
    shift = beta.astype(jnp.float32) - mean * scale

    # Bilinear x2 interpolation matrices (align_corners=True).
    ah = jnp.asarray(_interp_matrix_np(H, H2))                # [H2, H]
    awt = jnp.asarray(_interp_matrix_np(W, W2).T)             # [W, W2]

    # ---------------- pass 2: fused conv+ReLU+BN+upsample, NCHW output -------
    out = pl.pallas_call(
        _conv_bn_upsample_kernel,
        out_shape=jax.ShapeDtypeStruct((N, Cout, H2, W2), jnp.float32),
        grid_spec=pltpu.PrefetchScalarGridSpec(
            num_scalar_prefetch=0,
            grid=(N, Cout),
            in_specs=[
                pl.BlockSpec((1, Cin, H, W), lambda n, c: (n, 0, 0, 0)),
                pl.BlockSpec((1, Cin, 1, 1), lambda n, c: (c, 0, 0, 0)),
                pl.BlockSpec((1, 1, 1), lambda n, c: (c, 0, 0)),
                pl.BlockSpec((1, 1, 1), lambda n, c: (c, 0, 0)),
                pl.BlockSpec((H2, H), lambda n, c: (0, 0)),    # grid-invariant
                pl.BlockSpec((W, W2), lambda n, c: (0, 0)),    # grid-invariant
            ],
            out_specs=pl.BlockSpec((1, 1, H2, W2), lambda n, c: (n, c, 0, 0)),
        ),
        compiler_params=pltpu.CompilerParams(
            dimension_semantics=("parallel", "parallel")),
    )(x, w4, scale.reshape(Cout, 1, 1), shift.reshape(Cout, 1, 1), ah, awt)

    return out                                               # already NCHW


def _reference(x, conv_w, gamma, beta, eps=1e-5):
    N, Cin, H, W = x.shape
    Cout = conv_w.shape[0]
    y = jnp.einsum('oc,nchw->nohw', conv_w.reshape(Cout, Cin), x)
    y = jnp.maximum(y, 0.0)
    mean = y.mean(axis=(0, 2, 3), keepdims=True)
    var = y.var(axis=(0, 2, 3), keepdims=True)       # biased, as BN training does
    z = (y - mean) / jnp.sqrt(var + eps)
    z = z * gamma.reshape(1, -1, 1, 1) + beta.reshape(1, -1, 1, 1)
    Ah = jnp.asarray(_interp_matrix_np(H, 2 * H))
    Aw = jnp.asarray(_interp_matrix_np(W, 2 * W))
    return jnp.einsum('oh,nchw,pw->ncop', Ah, z, Aw)


if __name__ == "__main__":
    key = jax.random.PRNGKey(0)
    k1, k2, k3, k4 = jax.random.split(key, 4)
    N, Cin, Cout, H, W = 2, 4, 8, 16, 16

    x = jax.random.normal(k1, (N, Cin, H, W), dtype=jnp.float32)
    conv_w = 0.5 * jax.random.normal(k2, (Cout, Cin, 1, 1), dtype=jnp.float32)
    gamma = 1.0 + 0.1 * jax.random.normal(k3, (Cout,), dtype=jnp.float32)
    beta = 0.1 * jax.random.normal(k4, (Cout,), dtype=jnp.float32)

    out = transition_layer_forward(x, conv_w, gamma, beta)
    out = jax.block_until_ready(out)

    assert out.shape == (N, Cout, 2 * H, 2 * W)
    ref = _reference(x, conv_w, gamma, beta)
    np.testing.assert_allclose(np.asarray(out), np.asarray(ref), rtol=5e-2, atol=5e-2)
    print("KERNEL_OK")
</pallas_src>

<mosaic_0001>
module attributes {stable_mosaic.version = 11 : i64} {
  func.func @_conv_relu_stats_kernel(%arg0: i32, %arg1: i32, %arg2: memref<1x4x256xf32, #tpu.memory_space<vmem>>, %arg3: memref<8x4xf32, #tpu.memory_space<vmem>>, %arg4: memref<1x1x8x1xf32, #tpu.memory_space<vmem>>, %arg5: memref<1x1x8x1xf32, #tpu.memory_space<vmem>>) attributes {dimension_semantics = [#tpu.dimension_semantics<parallel>, #tpu.dimension_semantics<parallel>], iteration_bounds = array<i64: 2, 1>, scalar_prefetch = 0 : i64, scratch_operands = 0 : i64, tpu.core_type = #tpu.core_type<tc>, window_params = [{transform_indices = @transform_0, window_bounds = array<i64: 1, 4, 256>}, {pipeline_mode = #tpu.pipeline_mode<synchronous>, transform_indices = @transform_1, window_bounds = array<i64: 8, 4>}, {transform_indices = @transform_2, window_bounds = array<i64: 1, 1, 8, 1>}, {transform_indices = @transform_3, window_bounds = array<i64: 1, 1, 8, 1>}]} {
    %c0 = arith.constant 0 : index
    %c0_0 = arith.constant 0 : index
    %0 = vector.load %arg3[%c0, %c0_0] : memref<8x4xf32, #tpu.memory_space<vmem>>, vector<8x4xf32>
    %c0_1 = arith.constant 0 : index
    %c0_2 = arith.constant 0 : index
    %c0_3 = arith.constant 0 : index
    %1 = vector.load %arg2[%c0_1, %c0_2, %c0_3] : memref<1x4x256xf32, #tpu.memory_space<vmem>>, vector<1x4x256xf32>
    %2 = vector.shape_cast %1 : vector<1x4x256xf32> to vector<4x256xf32>
    %cst = arith.constant dense<0.000000e+00> : vector<8x256xf32>
    %3 = tpu.matmul %0, %2, %cst {dimension_numbers = #tpu.dot_dimension_numbers<[1], [0], [0], [1], [0, 0, 1, 1], [], []>} : vector<8x4xf32>, vector<4x256xf32>, vector<8x256xf32> -> vector<8x256xf32>
    %cst_4 = arith.constant 0.000000e+00 : f32
    %4 = vector.broadcast %cst_4 : f32 to vector<8x256xf32>
    %5 = arith.maximumf %3, %4 : vector<8x256xf32>
    %cst_5 = arith.constant dense<0.000000e+00> : vector<8xf32>
    %6 = vector.multi_reduction <add>, %5, %cst_5 [1] : vector<8x256xf32> to vector<8xf32>
    %7 = vector.shape_cast %6 : vector<8xf32> to vector<8x1xf32>
    %c0_6 = arith.constant 0 : index
    %c0_7 = arith.constant 0 : index
    %c0_8 = arith.constant 0 : index
    %c0_9 = arith.constant 0 : index
    %8 = vector.load %arg4[%c0_6, %c0_7, %c0_8, %c0_9] : memref<1x1x8x1xf32, #tpu.memory_space<vmem>>, vector<1x1x8x1xf32>
    %9 = vector.shape_cast %8 : vector<1x1x8x1xf32> to vector<8x1xf32>
    %10 = vector.shape_cast %7 : vector<8x1xf32> to vector<1x1x8x1xf32>
    tpu.vector_store %arg4[%c0_6, %c0_7, %c0_8, %c0_9], %10 {strides = array<i32>} : memref<1x1x8x1xf32, #tpu.memory_space<vmem>>, vector<1x1x8x1xf32>,
    %11 = arith.mulf %5, %5 : vector<8x256xf32>
    %cst_10 = arith.constant dense<0.000000e+00> : vector<8xf32>
    %12 = vector.multi_reduction <add>, %11, %cst_10 [1] : vector<8x256xf32> to vector<8xf32>
    %13 = vector.shape_cast %12 : vector<8xf32> to vector<8x1xf32>
    %c0_11 = arith.constant 0 : index
    %c0_12 = arith.constant 0 : index
    %c0_13 = arith.constant 0 : index
    %c0_14 = arith.constant 0 : index
    %14 = vector.load %arg5[%c0_11, %c0_12, %c0_13, %c0_14] : memref<1x1x8x1xf32, #tpu.memory_space<vmem>>, vector<1x1x8x1xf32>
    %15 = vector.shape_cast %14 : vector<1x1x8x1xf32> to vector<8x1xf32>
    %16 = vector.shape_cast %13 : vector<8x1xf32> to vector<1x1x8x1xf32>
    tpu.vector_store %arg5[%c0_11, %c0_12, %c0_13, %c0_14], %16 {strides = array<i32>} : memref<1x1x8x1xf32, #tpu.memory_space<vmem>>, vector<1x1x8x1xf32>,
    return
  }
  func.func @transform_0(%arg0: i32, %arg1: i32) -> (i32, i32, i32) {
    %c0_i32 = arith.constant 0 : i32
    %c0_i32_0 = arith.constant 0 : i32
    return %arg0, %c0_i32, %arg1 : i32, i32, i32
  }
  func.func @transform_1(%arg0: i32, %arg1: i32) -> (i32, i32) {
    %c0_i32 = arith.constant 0 : i32
    %c0_i32_0 = arith.constant 0 : i32
    %c0_i32_1 = arith.constant 0 : i32
    return %c0_i32, %c0_i32_0 : i32, i32
  }
  func.func @transform_2(%arg0: i32, %arg1: i32) -> (i32, i32, i32, i32) {
    %c0_i32 = arith.constant 0 : i32
    %c0_i32_0 = arith.constant 0 : i32
    %c0_i32_1 = arith.constant 0 : i32
    return %arg0, %arg1, %c0_i32, %c0_i32_0 : i32, i32, i32, i32
  }
  func.func @transform_3(%arg0: i32, %arg1: i32) -> (i32, i32, i32, i32) {
    %c0_i32 = arith.constant 0 : i32
    %c0_i32_0 = arith.constant 0 : i32
    %c0_i32_1 = arith.constant 0 : i32
    return %arg0, %arg1, %c0_i32, %c0_i32_0 : i32, i32, i32, i32
  }
}

</mosaic_0001>

<bundles_post_ra>
// kernel: tpu_custom_call.1
= control target key start
LH: loop header
LB: loop body
LE: loop exit
PB: predicated region body
PF: predicated region fallthrough
CT: control target
= control target key end

     0   :  { %9 = vsyncpa [#allocation3], 0  ;;  %s764_s0 = inlined_call_operand.hbm [shape: f32[2,4,256], index: 0, kind: input, shape index: {}]   ;;  %s765_s1 = inlined_call_operand.vmem [shape: f32[8,4], index: 1, kind: input, shape index: {}]   ;;  %s766_s2 = inlined_call_operand.vmem [shape: f32[2,1,8,1], index: 2, kind: output, shape index: {0}]   ;;  %s767_s3 = inlined_call_operand.vmem [shape: f32[2,1,8,1], index: 3, kind: output, shape index: {1}]  }
   0x1   :  { %11 = vsyncpa [#allocation3 + $0x1], 0  ;;  %s633_s12 = smov 0   ;;  %s635_s13 = smov 0  }
   0x2   :  { %s637_s14 = smov 0   ;;  %s639_s15 = smov 0  }
   0x3   :  { %s641_s16 = smov 0   ;;  %s643_s17 = smov 0  }
   0x4 LB: > { %s455_s18 = sadd.s32 4294967295, %s609_s17   ;;  %s29_s19 = sadd.s32 1, %s605_s16  ;;  %s609_s17 = sphi %s643_s17, %s17_s17   ;;  %s605_s16 = sphi %s641_s16, %s777_s16   ;;  %s601_s15 = sphi %s639_s15, %s776_s15   ;;  %s597_s14 = sphi %s637_s14, %s775_s14   ;;  %s593_s13 = sphi %s635_s13, %s774_s13   ;;  %s589_s12 = sphi %s633_s12, %s773_s12  }
   0x5   : > { %p31_p0 = scmp.ge.s32.totalorder %s29_s19, 2  ;;  %s38_s20 = sadd.s32 1, %s597_s14 }
   0x6   : > { %p45_p1 = scmp.ne.s32.totalorder %s597_s14, %s593_s13  ;;  %p46_p2 = scmp.eq.s32.totalorder %s609_s17, 0 }
   0x7   : > { %s779_s19 = smov (%p31_p0, %s29_s19), 0  ;;  %p51_p4 = scmp.ne.s32.totalorder %s593_s13, %s589_s12 }
   0x8   : > { %p669_p3 = por %p46_p2, %p45_p1  ;;  %s33_s22 = ssub.s32 %s605_s16, %s779_s19 }
   0x9   : > { %p52_p5 = scmp.eq.s32.totalorder %s455_s18, 0  ;;  %p36_p6 = scmp.eq.s32.totalorder %s33_s22, 0 }
   0xa   : > { %p478_p8 = scmp.lt.s32.totalorder %s609_s17, 2  ;;  %s155_s25 = sand.u32 1, %s597_s14  }
   0xb   : > { %p676_p7 = por %p52_p5, %p51_p4  ;;  %s471_s26 = sshll.u32 %s605_s16, 7 }
   0xc   : > { %s682_s24 = scalar_select %p36_p6, %s597_s14, %s38_s20  }
   0xd   : > { %s459_s27 = sshll.u32 %s155_s25, 3  ;;  %s689_s30 = scalar_lea.hbm %s764_s0, %s471_s26 }
   0xe   : > { %s159_s4 = scalar_lea.vmem [#allocation2], %s459_s27  ;;  %p693_p9 = pnand %p478_p8, %p669_p3 }
   0xf   : > { %s169_s5 = sshll.u32 %s159_s4, 4  ;;  %s156_s7 = scalar_lea.sflag [#allocation3], %s155_s25  ;;  %s697_s5 = int_to_ptr.vmem [resolvable:$true] %s169_s5 }
  0x10   : > { %s529_s8 = scalar_lea.hbm %s689_s30, 128  ;;  %p531_p13 = pneg %p693_p9 }
  0x11   : > { %p530_p12 = scmp.ne.s32.totalorder %s689_s30, %s529_s8  ;;  %s534_s11 = scalar_lea.hbm %s764_s0, 256 }
  0x12   : > { %p535_p2 = scmp.lt.u32.totalorder %s689_s30, %s764_s0  ;;  %p536_p3 = scmp.lt.u32.totalorder %s534_s11, %s529_s8 }
  0x13   : > { %p532_p0 = pnand %p531_p13, %p530_p12  ;;  %p538_p5 = scmp.lt.u32.totalorder %s529_s8, %s689_s30 }
  0x14   : > { %p537_p4 = por %p536_p3, %p535_p2 }
  0x15   : > { %p533_p1 = pneg %p532_p0 }
  0x16   : > { %p539_p6 = por %p538_p5, %p537_p4 }
  0x18   : > { %p540_p8 = pnand %p539_p6, %p533_p1 }
  0x1a   : > { %543 = shalt.err (!%p540_p8)
}
  0x1b   : > { %s544_s20 = scalar_lea.vmem %s697_s5, 128  ;;  %s611_s21 = smov [#allocation2]  }
  0x1c   : > { %p545_p12 = scmp.ne.s32.totalorder %s697_s5, %s544_s20  ;;  %s549_s22 = sshll.u32 %s611_s21, 4  ;;  %s550_s22 = int_to_ptr.vmem [resolvable:$false] %s549_s22 }
  0x1d   : > { %s551_s25 = scalar_lea.vmem %s550_s22, 256  ;;  %p552_p11 = scmp.lt.s32.totalorder %s697_s5, %s550_s22 }
  0x1e   : > { %p547_p0 = pnand %p545_p12, %p531_p13  ;;  %p553_p2 = scmp.lt.s32.totalorder %s551_s25, %s544_s20 }
  0x20   : > { %p548_p10 = pneg %p547_p0  ;;  %p554_p3 = por %p553_p2, %p552_p11 }
  0x22   : > { %p555_p4 = pnand %p554_p3, %p548_p10 }
  0x24   : > { %558 = shalt.err (!%p555_p4)
}
  0x25   : > { %477 = dma.hbm_to_vmem [thread:$0]  (!%p693_p9), %s689_s30, 128, %s697_s5, %s156_s7  }
  0x26   : > { %p771_p1 = scmp.lt.s32.totalorder %s609_s17, 3  ;;  %p772_p5 = scmp.ge.s32.totalorder %s609_s17, 1 }
  0x28   : > { %p175_p13 = pnand %p772_p5, %p771_p1 }
  0x29   : > { %s180_s26 = sand.u32 (!%p175_p13), 1, %s593_s13  }
  0x2a   : > { %178 = sbr.rel (%p175_p13) target bundleno = 419 (0x1a3), region = 28  ;;  %s463_s27 = sshll.u32 (!%p175_p13), %s180_s26, 3 }
  0x2b   : > { %s181_s28 = scalar_lea.sflag (!%p175_p13), [#allocation3], %s180_s26  ;;  %s184_s29 = scalar_lea.vmem (!%p175_p13), [#allocation2], %s463_s27 }
  0x31   : > { %584 = dma.done.wait (%p676_p7), %s181_s28, 128  }
  0x32   : > { %586 = vsyncadd (%p676_p7), %s181_s28, 4294967168  ;;  %v612_v0 = vmov 0.0   ;;  %v232_v1 = vld [vmem:[%s184_s29] sm:$0xff]  ;;  %vm239_vm0 = vcmask 1043456   ;;  %vm235_vm1 = vcmask 31744   ;;  %p217_p7 = scmp.lt.s32.totalorder %s601_s15, 1 }
  0x33   : > { %308 = vmatprep.mubr.f32.mxu0 %v612_v0  ;;  %v234_v2 = vcombine.high %v232_v1, %v232_v1  ;;  %v231_v3 = vld [vmem:[%s765_s1] sm:$0xff]  ;;  %vm320_vm2 = vcmask 7168  }
  0x34   : > { %s781_s15 = smov (!%p217_p7, %s601_s15), 1 }
  0x35   : > { %466 = vmatprep.subr.msk.mxu0 %vm239_vm0, %v234_v2  ;;  %s464_s23 = sshll.u32 %s781_s15, 3 }
  0x36   : > { %467 = vmatpush1.msk.msra.mxu0 %vm239_vm0, %v232_v1  ;;  %s223_s7 = scalar_lea.vmem %s766_s2, %s464_s23  ;;  %s230_s10 = scalar_lea.vmem %s767_s3, %s464_s23 }
  0x37   : > { %468 = vmatmul.mubr.msk.f32.vlgmr.msra.gmra.mrb[0].mxu0 %vm235_vm1, %v231_v3 }
 0x10a   : > { %v310_v4 = vpop.f32.mrb[0].mxu0 }
 0x10b   : > { %v315_v5 = vmax.f32 %v310_v4, 0.0  ;;  %v312_v6 = vpop.f32.mrb[1].mxu0 }
 0x10c   : > { %v316_v7 = vmax.f32 %v312_v6, 0.0 }
 0x10d   : > { %v322_v8 = vmul.f32 %v315_v5, %v315_v5 }
 0x10e   : > { %v323_v9 = vmul.f32 %v316_v7, %v316_v7  ;;  %v317_v10 = vadd.f32 %v316_v7, %v315_v5 }
 0x110   : > { %318 = vadd.xlane.f32.xlu0 %v317_v10  ;;  %v324_v11 = vadd.f32 %v323_v9, %v322_v8 }
 0x114   : > { %325 = vadd.xlane.f32.xlu0 %v324_v11 }
 0x19d   : > { %v319_v12 = vpop.xlane.xlu0 %318 }
 0x19e   : > { %321 = vst.msk [vmem:[%s223_s7] sm:$0xff] %vm320_vm2, %v319_v12 }
 0x1a1   : > { %v326_v13 = vpop.xlane.xlu0 %325 }
 0x1a2   : > { %327 = vst.msk [vmem:[%s230_s10] sm:$0xff] %vm320_vm2, %v326_v13 }
 0x1a3 PF: > { %s17_s17 = sadd.s32 1, %s609_s17   ;;  %s773_s12 = smov %s593_s13 }
 0x1a4   : > { %p14_p9 = scmp.ge.s32.totalorder %s17_s17, 4   ;;  %s774_s13 = smov %s597_s14 }
 0x1a5   : > { %s775_s14 = smov %s682_s24  ;;  %s776_s15 = smov %s605_s16 }
 0x1a6   : > { %s777_s16 = smov %s779_s19  ;;  %16 = sbr.rel (!%p14_p9) target bundleno = 4 (0x4), region = 80 }
 0x1ad   :  { %373 = vsyncpa [#allocation3], 1 }
 0x1ae   :  { %375 = vsyncpa [#allocation3 + $0x1], 1 }

</bundles_post_ra>
